<compile_context>
chip_gen: v7x
topology: tpu7x:2x2x1
jax: 0.10.0
libtpu: 0.0.40
codegen_flags: <defaults>
</compile_context>

<pallas_src>
import jax
import jax.numpy as jnp
from jax.experimental import pallas as pl
from jax.experimental.pallas import tpu as pltpu

# Model dimensions (small, synthetic).
B = 2              # batch
S = 8              # sequence length
H = 32             # hidden size
NUM_HEADS = 2
HEAD_DIM = H // NUM_HEADS
FFN = 64           # feed-forward inner size
V = 128            # vocab size (lane-dense one-hot embedding)
OUT_PAD = 128      # lane-dense padded width for every intermediate
LN_EPS = 1e-5
BS = B * S
G = NUM_HEADS * B  # fused (head, batch) attention batch axis, g = h*B + b

# bf16 weight-slab block indices (each block is OUT_PAD rows of the [896,128] slab).
EMB, WQ, WK, WV, WO, W1, W2 = range(7)
# f32 slab row indices.
R_BO, R_G1, R_B1, R_BF2, R_G2, R_B2, R_BF1, R_BQ, R_BK, R_BV = range(10)
R_NB = 16                      # rows 16:48 = key-mask bias replicated to [G*S, S]
FSLAB_ROWS = R_NB + G * S      # 48


def _combine_embedding_kernel(ids_ref, w_ref, f_ref, out_ref):
    f32, bf16 = jnp.float32, jnp.bfloat16

    fv = f_ref[...]                                            # [48,128] f32 packed slab

    def wblk(i):                                               # 128-aligned static ref slice (free)
        return w_ref[i * OUT_PAD:(i + 1) * OUT_PAD, :]

    # ---- embedding lookup: one-hot (V = 128 lanes) MXU matmul, lane-dense [BS, 128] output ----
    ids = ids_ref[...]                                         # [BS, 1] int32
    iota_v = jax.lax.broadcasted_iota(jnp.int32, (BS, V), 1)
    one_hot = (iota_v == ids).astype(bf16)                     # [BS, V]
    x = jnp.dot(one_hot, wblk(EMB), preferred_element_type=f32)    # [BS, 128], lanes H:128 == 0
    xb = x.astype(bf16)

    # ---- Q/K/V projections (weights zero-padded to 128 lanes; 1/sqrt(d) pre-folded into W_q) ----
    q = jnp.dot(xb, wblk(WQ), preferred_element_type=f32) + fv[R_BQ:R_BQ + 1]
    k = jnp.dot(xb, wblk(WK), preferred_element_type=f32) + fv[R_BK:R_BK + 1]
    v = jnp.dot(xb, wblk(WV), preferred_element_type=f32) + fv[R_BV:R_BV + 1]

    # tile-aligned reshapes (16 rows -> 2 x 8 sublanes), no lane movement
    q3 = q.reshape(B, S, OUT_PAD)
    k3 = k.reshape(B, S, OUT_PAD)
    v3 = v.reshape(B, S, OUT_PAD)

    # ---- head separation via lane masks (no 16-lane slicing / concat relayouts) ----
    lane = jax.lax.broadcasted_iota(jnp.int32, (1, 1, OUT_PAD), 2)
    m0 = (lane < HEAD_DIM).astype(f32)                         # head 0: lanes [0, 16)
    m1 = ((lane >= HEAD_DIM) & (lane < H)).astype(f32)         # head 1: lanes [16, 32)

    qg = jnp.concatenate([q3, q3], axis=0).astype(bf16)        # [G, S, 128]
    kg = jnp.concatenate([k3 * m0, k3 * m1], axis=0).astype(bf16)
    vg = jnp.concatenate([v3 * m0, v3 * m1], axis=0).astype(bf16)

    # additive key-mask bias, pre-replicated in the wrapper to [G*S, S] slab rows
    nb = fv[R_NB:R_NB + G * S, 0:S].reshape(G, S, S)

    scores = jnp.einsum('gqd,gkd->gqk', qg, kg, preferred_element_type=f32) + nb   # [G,S,S]
    scores = scores - jnp.max(scores, axis=-1, keepdims=True)
    e = jnp.exp(scores)
    # approx reciprocal: rows sum to 1 only to ~1e-3 (EUP slot); covered by the test tolerance
    p = e * pl.reciprocal(jnp.sum(e, axis=-1, keepdims=True), approx=True)

    ctx_g = jnp.einsum('gqk,gkd->gqd', p.astype(bf16), vg, preferred_element_type=f32)  # [G,S,128]
    # merge heads: masked V puts head-0 / head-1 context in disjoint lanes -> just add halves
    ctx = (ctx_g[0:B] + ctx_g[B:2 * B]).reshape(BS, OUT_PAD)

    attn = jnp.dot(ctx.astype(bf16), wblk(WO), preferred_element_type=f32) + fv[R_BO:R_BO + 1]

    # ---- LayerNorm over the H real lanes (pad lanes are 0; gamma/beta zero-padded keep them 0) ----
    hmask = (jax.lax.broadcasted_iota(jnp.int32, (1, OUT_PAD), 1) < H).astype(f32)
    inv_h = 1.0 / H

    def layer_norm(z, g, b):
        mu = jnp.sum(z, axis=-1, keepdims=True) * inv_h
        d = z - mu
        var = jnp.sum(d * d * hmask, axis=-1, keepdims=True) * inv_h
        return d * jax.lax.rsqrt(var + LN_EPS) * g + b

    x1 = layer_norm(x + attn, fv[R_G1:R_G1 + 1], fv[R_B1:R_B1 + 1])

    # ---- FFN with tanh-approx GELU (elementwise math in f32) ----
    h1 = jnp.dot(x1.astype(bf16), wblk(W1), preferred_element_type=f32) + fv[R_BF1:R_BF1 + 1]
    h1 = 0.5 * h1 * (1.0 + jnp.tanh(0.7978845608028654 * (h1 + 0.044715 * h1 * h1 * h1)))
    ff = jnp.dot(h1.astype(bf16), wblk(W2), preferred_element_type=f32) + fv[R_BF2:R_BF2 + 1]
    x2 = layer_norm(x1 + ff, fv[R_G2:R_G2 + 1], fv[R_B2:R_B2 + 1])

    out_ref[...] = x2                                          # lane-dense [BS, 128] store


def init_params(key):
    """Logical (unpacked) parameters, used by the pure-JAX reference."""
    ks = jax.random.split(key, 9)
    s = 0.05
    bf16 = jnp.bfloat16
    return {
        "emb":   jax.random.normal(ks[0], (V, H), jnp.float32).astype(bf16),
        "w_q":   (jax.random.normal(ks[1], (H, H), jnp.float32) * s).astype(bf16),
        "w_k":   (jax.random.normal(ks[2], (H, H), jnp.float32) * s).astype(bf16),
        "w_v":   (jax.random.normal(ks[3], (H, H), jnp.float32) * s).astype(bf16),
        "b_q":   jax.random.normal(ks[4], (1, H), jnp.float32) * s,
        "b_k":   jnp.zeros((1, H), jnp.float32),
        "b_v":   jnp.zeros((1, H), jnp.float32),
        "w_o":   (jax.random.normal(ks[5], (H, H), jnp.float32) * s).astype(bf16),
        "b_o":   jnp.zeros((1, H), jnp.float32),
        "ln1_g": jnp.ones((1, H), jnp.float32),
        "ln1_b": jnp.zeros((1, H), jnp.float32),
        "w_1":   (jax.random.normal(ks[6], (H, FFN), jnp.float32) * s).astype(bf16),
        "b_f1":  jax.random.normal(ks[7], (1, FFN), jnp.float32) * s,
        "w_2":   (jax.random.normal(ks[8], (FFN, H), jnp.float32) * s).astype(bf16),
        "b_f2":  jnp.zeros((1, H), jnp.float32),
        "ln2_g": jnp.ones((1, H), jnp.float32),
        "ln2_b": jnp.zeros((1, H), jnp.float32),
    }


def _pad_block(a):
    out = jnp.zeros((OUT_PAD, OUT_PAD), a.dtype)
    return out.at[:a.shape[0], :a.shape[1]].set(a)


def pack_params(p):
    """Pack all parameters into one bf16 weight slab and one f32 vector slab (lane-dense)."""
    scale = 1.0 / (HEAD_DIM ** 0.5)            # 0.25: exact in bf16, folded into W_q / b_q
    wslab = jnp.concatenate([
        _pad_block(p["emb"]),
        _pad_block(p["w_q"] * scale),
        _pad_block(p["w_k"]),
        _pad_block(p["w_v"]),
        _pad_block(p["w_o"]),
        _pad_block(p["w_1"]),
        _pad_block(p["w_2"]),
    ], axis=0)                                                  # [896, 128] bf16
    rows = [p["b_o"], p["ln1_g"], p["ln1_b"], p["b_f2"], p["ln2_g"], p["ln2_b"],
            p["b_f1"], p["b_q"] * scale, p["b_k"], p["b_v"]]
    fvec = jnp.zeros((R_NB, OUT_PAD), jnp.float32)
    for i, r in enumerate(rows):
        fvec = fvec.at[i, :r.shape[-1]].set(r[0])
    return wslab, fvec                                          # [896,128] bf16, [16,128] f32


@jax.jit
def combine_embedding_forward(ids, mask, wslab, fvec):
    """ids: [B, S] int32 token ids, mask: [B, S] (1 = attend, 0 = masked) -> [B, S, H]."""
    ids2 = ids.reshape(BS, 1).astype(jnp.int32)

    # key-mask bias prepared (and replicated over heads + query rows) in the wrapper: free
    neg_b = (1.0 - mask.astype(jnp.float32)) * (-1e9)           # [B, S]
    neg_g = jnp.concatenate([neg_b, neg_b], axis=0)             # [G, S], g = h*B + b
    nb_rows = jnp.zeros((G * S, OUT_PAD), jnp.float32).at[:, :S].set(
        jnp.repeat(neg_g, S, axis=0))                           # [G*S, 128]
    fslab = jnp.concatenate([fvec, nb_rows], axis=0)            # [48, 128] f32

    out = pl.pallas_call(
        _combine_embedding_kernel,
        out_shape=jax.ShapeDtypeStruct((BS, OUT_PAD), jnp.float32),
        in_specs=[pl.BlockSpec(memory_space=pltpu.MemorySpace.VMEM)] * 3,
        out_specs=pl.BlockSpec(memory_space=pltpu.MemorySpace.VMEM),
    )(ids2, wslab, fslab)
    return out[:, :H].reshape(B, S, H)


def reference_forward(ids, mask, p):
    """Pure-JAX reference mirroring the kernel math (bf16 MXU operands, f32 accumulation)."""
    f32, bf16 = jnp.float32, jnp.bfloat16
    x = p["emb"][ids.reshape(-1)].astype(f32)                   # [BS, H]
    xb = x.astype(bf16)
    scale = 1.0 / (HEAD_DIM ** 0.5)
    q = jnp.dot(xb, p["w_q"], preferred_element_type=f32) * scale + p["b_q"] * scale
    k = jnp.dot(xb, p["w_k"], preferred_element_type=f32) + p["b_k"]
    v = jnp.dot(xb, p["w_v"], preferred_element_type=f32) + p["b_v"]
    neg = (1.0 - mask.astype(f32)) * (-1e9)                     # [B, S]

    ctx_heads = []
    for h in range(NUM_HEADS):
        sl = slice(h * HEAD_DIM, (h + 1) * HEAD_DIM)
        qh = q[:, sl].reshape(B, S, HEAD_DIM).astype(bf16)
        kh = k[:, sl].reshape(B, S, HEAD_DIM).astype(bf16)
        vh = v[:, sl].reshape(B, S, HEAD_DIM).astype(bf16)
        sc = jnp.einsum('bqd,bkd->bqk', qh, kh, preferred_element_type=f32) + neg[:, None, :]
        sc = sc - jnp.max(sc, axis=-1, keepdims=True)
        e = jnp.exp(sc)
        pr = e / jnp.sum(e, axis=-1, keepdims=True)
        ch = jnp.einsum('bqk,bkd->bqd', pr.astype(bf16), vh, preferred_element_type=f32)
        ctx_heads.append(ch.reshape(BS, HEAD_DIM))
    ctx = jnp.concatenate(ctx_heads, axis=-1)                   # [BS, H]
    attn = jnp.dot(ctx.astype(bf16), p["w_o"], preferred_element_type=f32) + p["b_o"]

    def ln(z, g, b):
        mu = jnp.mean(z, axis=-1, keepdims=True)
        var = jnp.mean((z - mu) ** 2, axis=-1, keepdims=True)
        return (z - mu) * jax.lax.rsqrt(var + LN_EPS) * g + b

    x1 = ln(x + attn, p["ln1_g"], p["ln1_b"])
    h1 = jnp.dot(x1.astype(bf16), p["w_1"], preferred_element_type=f32) + p["b_f1"]
    h1 = 0.5 * h1 * (1.0 + jnp.tanh(0.7978845608028654 * (h1 + 0.044715 * h1 ** 3)))
    ff = jnp.dot(h1.astype(bf16), p["w_2"], preferred_element_type=f32) + p["b_f2"]
    x2 = ln(x1 + ff, p["ln2_g"], p["ln2_b"])
    return x2.reshape(B, S, H)


if __name__ == "__main__":
    key = jax.random.PRNGKey(0)
    k_ids, k_p = jax.random.split(key)

    ids = jax.random.randint(k_ids, (B, S), 0, V, dtype=jnp.int32)
    # mask: 1 = attend, 0 = masked; mask the last two key positions of batch 1.
    mask = jnp.ones((B, S), jnp.float32).at[1, -2:].set(0.0)

    params = init_params(k_p)
    wslab, fvec = pack_params(params)

    out = combine_embedding_forward(ids, mask, wslab, fvec)
    out = jax.block_until_ready(out)

    ref = reference_forward(ids, mask, params)
    assert out.shape == (B, S, H)
    # tolerance covers approx softmax reciprocal (~1e-3) and EUP exp/tanh/rsqrt rounding
    assert jnp.allclose(out, ref, atol=1e-2, rtol=1e-2), "Pallas output mismatch vs reference"

    print("KERNEL_OK")
</pallas_src>

<mosaic_0001>
module attributes {stable_mosaic.version = 11 : i64} {
  func.func @_combine_embedding_kernel(%arg0: memref<16x1xi32, #tpu.memory_space<vmem>>, %arg1: memref<896x128xbf16, #tpu.memory_space<vmem>>, %arg2: memref<48x128xf32, #tpu.memory_space<vmem>>, %arg3: memref<16x128xf32, #tpu.memory_space<vmem>>) attributes {dimension_semantics = [], scalar_prefetch = 0 : i64, scratch_operands = 0 : i64, tpu.core_type = #tpu.core_type<tc>} {
    %c0 = arith.constant 0 : index
    %c0_0 = arith.constant 0 : index
    %0 = vector.load %arg2[%c0, %c0_0] : memref<48x128xf32, #tpu.memory_space<vmem>>, vector<48x128xf32>
    %c0_1 = arith.constant 0 : index
    %c0_2 = arith.constant 0 : index
    %1 = vector.load %arg0[%c0_1, %c0_2] : memref<16x1xi32, #tpu.memory_space<vmem>>, vector<16x1xi32>
    %2 = tpu.iota {dimensions = array<i32: 1>} : vector<16x128xi32>
    %3 = vector.broadcast %1 : vector<16x1xi32> to vector<16x128xi32>
    %4 = arith.cmpi eq, %2, %3 : vector<16x128xi32>
    %5 = arith.extui %4 : vector<16x128xi1> to vector<16x128xi32>
    %6 = arith.sitofp %5 : vector<16x128xi32> to vector<16x128xf32>
    %7 = arith.truncf %6 : vector<16x128xf32> to vector<16x128xbf16>
    %c0_3 = arith.constant 0 : index
    %c0_4 = arith.constant 0 : index
    %8 = vector.load %arg1[%c0_3, %c0_4] : memref<896x128xbf16, #tpu.memory_space<vmem>>, vector<128x128xbf16>
    %cst = arith.constant dense<0.000000e+00> : vector<16x128xf32>
    %9 = tpu.matmul %7, %8, %cst {dimension_numbers = #tpu.dot_dimension_numbers<[1], [0], [0], [1], [0, 0, 1, 1], [], []>} : vector<16x128xbf16>, vector<128x128xbf16>, vector<16x128xf32> -> vector<16x128xf32>
    %10 = arith.truncf %9 : vector<16x128xf32> to vector<16x128xbf16>
    %c128 = arith.constant 128 : index
    %c0_5 = arith.constant 0 : index
    %11 = vector.load %arg1[%c128, %c0_5] : memref<896x128xbf16, #tpu.memory_space<vmem>>, vector<128x128xbf16>
    %cst_6 = arith.constant dense<0.000000e+00> : vector<16x128xf32>
    %12 = tpu.matmul %10, %11, %cst_6 {dimension_numbers = #tpu.dot_dimension_numbers<[1], [0], [0], [1], [0, 0, 1, 1], [], []>} : vector<16x128xbf16>, vector<128x128xbf16>, vector<16x128xf32> -> vector<16x128xf32>
    %13 = vector.extract_strided_slice %0 {offsets = [7, 0], sizes = [1, 128], strides = [1, 1]} : vector<48x128xf32> to vector<1x128xf32>
    %14 = vector.broadcast %13 : vector<1x128xf32> to vector<16x128xf32>
    %15 = arith.addf %12, %14 : vector<16x128xf32>
    %c256 = arith.constant 256 : index
    %c0_7 = arith.constant 0 : index
    %16 = vector.load %arg1[%c256, %c0_7] : memref<896x128xbf16, #tpu.memory_space<vmem>>, vector<128x128xbf16>
    %cst_8 = arith.constant dense<0.000000e+00> : vector<16x128xf32>
    %17 = tpu.matmul %10, %16, %cst_8 {dimension_numbers = #tpu.dot_dimension_numbers<[1], [0], [0], [1], [0, 0, 1, 1], [], []>} : vector<16x128xbf16>, vector<128x128xbf16>, vector<16x128xf32> -> vector<16x128xf32>
    %18 = vector.extract_strided_slice %0 {offsets = [8, 0], sizes = [1, 128], strides = [1, 1]} : vector<48x128xf32> to vector<1x128xf32>
    %19 = vector.broadcast %18 : vector<1x128xf32> to vector<16x128xf32>
    %20 = arith.addf %17, %19 : vector<16x128xf32>
    %c384 = arith.constant 384 : index
    %c0_9 = arith.constant 0 : index
    %21 = vector.load %arg1[%c384, %c0_9] : memref<896x128xbf16, #tpu.memory_space<vmem>>, vector<128x128xbf16>
    %cst_10 = arith.constant dense<0.000000e+00> : vector<16x128xf32>
    %22 = tpu.matmul %10, %21, %cst_10 {dimension_numbers = #tpu.dot_dimension_numbers<[1], [0], [0], [1], [0, 0, 1, 1], [], []>} : vector<16x128xbf16>, vector<128x128xbf16>, vector<16x128xf32> -> vector<16x128xf32>
    %23 = vector.extract_strided_slice %0 {offsets = [9, 0], sizes = [1, 128], strides = [1, 1]} : vector<48x128xf32> to vector<1x128xf32>
    %24 = vector.broadcast %23 : vector<1x128xf32> to vector<16x128xf32>
    %25 = arith.addf %22, %24 : vector<16x128xf32>
    %26 = vector.shape_cast %15 : vector<16x128xf32> to vector<2x8x128xf32>
    %27 = vector.shape_cast %20 : vector<16x128xf32> to vector<2x8x128xf32>
    %28 = vector.shape_cast %25 : vector<16x128xf32> to vector<2x8x128xf32>
    %29 = tpu.iota {dimensions = array<i32: 2>} : vector<1x1x128xi32>
    %c16_i32 = arith.constant 16 : i32
    %30 = vector.broadcast %c16_i32 : i32 to vector<1x1x128xi32>
    %31 = arith.cmpi slt, %29, %30 : vector<1x1x128xi32>
    %32 = arith.extui %31 : vector<1x1x128xi1> to vector<1x1x128xi32>
    %33 = arith.sitofp %32 : vector<1x1x128xi32> to vector<1x1x128xf32>
    %c16_i32_11 = arith.constant 16 : i32
    %34 = vector.broadcast %c16_i32_11 : i32 to vector<1x1x128xi32>
    %35 = arith.cmpi sge, %29, %34 : vector<1x1x128xi32>
    %c32_i32 = arith.constant 32 : i32
    %36 = vector.broadcast %c32_i32 : i32 to vector<1x1x128xi32>
    %37 = arith.cmpi slt, %29, %36 : vector<1x1x128xi32>
    %38 = arith.andi %35, %37 : vector<1x1x128xi1>
    %39 = arith.extui %38 : vector<1x1x128xi1> to vector<1x1x128xi32>
    %40 = arith.sitofp %39 : vector<1x1x128xi32> to vector<1x1x128xf32>
    %41 = tpu.concatenate %26, %26 in 0 : vector<2x8x128xf32>, vector<2x8x128xf32> -> vector<4x8x128xf32>
    %42 = arith.truncf %41 : vector<4x8x128xf32> to vector<4x8x128xbf16>
    %43 = vector.broadcast %33 : vector<1x1x128xf32> to vector<2x8x128xf32>
    %44 = arith.mulf %27, %43 : vector<2x8x128xf32>
    %45 = vector.broadcast %40 : vector<1x1x128xf32> to vector<2x8x128xf32>
    %46 = arith.mulf %27, %45 : vector<2x8x128xf32>
    %47 = tpu.concatenate %44, %46 in 0 : vector<2x8x128xf32>, vector<2x8x128xf32> -> vector<4x8x128xf32>
    %48 = arith.truncf %47 : vector<4x8x128xf32> to vector<4x8x128xbf16>
    %49 = vector.broadcast %33 : vector<1x1x128xf32> to vector<2x8x128xf32>
    %50 = arith.mulf %28, %49 : vector<2x8x128xf32>
    %51 = vector.broadcast %40 : vector<1x1x128xf32> to vector<2x8x128xf32>
    %52 = arith.mulf %28, %51 : vector<2x8x128xf32>
    %53 = tpu.concatenate %50, %52 in 0 : vector<2x8x128xf32>, vector<2x8x128xf32> -> vector<4x8x128xf32>
    %54 = arith.truncf %53 : vector<4x8x128xf32> to vector<4x8x128xbf16>
    %55 = vector.extract_strided_slice %0 {offsets = [16, 0], sizes = [32, 8], strides = [1, 1]} : vector<48x128xf32> to vector<32x8xf32>
    %56 = vector.shape_cast %55 : vector<32x8xf32> to vector<4x8x8xf32>
    "tpu.trace_start"() <{level = 10 : i32, message = "gqd,gkd->gqk"}> : () -> ()
    %cst_12 = arith.constant dense<0.000000e+00> : vector<4x8x8xf32>
    %57 = tpu.matmul %42, %48, %cst_12 {dimension_numbers = #tpu.dot_dimension_numbers<[2], [2], [1], [1], [0, 0, 0, 1, 1, 1], [0], [0]>} : vector<4x8x128xbf16>, vector<4x8x128xbf16>, vector<4x8x8xf32> -> vector<4x8x8xf32>
    "tpu.trace_stop"() : () -> ()
    %58 = arith.addf %57, %56 : vector<4x8x8xf32>
    %cst_13 = arith.constant dense<0xFF800000> : vector<4x8xf32>
    %59 = vector.multi_reduction <maximumf>, %58, %cst_13 [2] : vector<4x8x8xf32> to vector<4x8xf32>
    %60 = vector.shape_cast %59 : vector<4x8xf32> to vector<4x8x1xf32>
    %61 = vector.broadcast %60 : vector<4x8x1xf32> to vector<4x8x8xf32>
    %62 = arith.subf %58, %61 : vector<4x8x8xf32>
    %63 = math.exp %62 : vector<4x8x8xf32>
    %cst_14 = arith.constant dense<0.000000e+00> : vector<4x8xf32>
    %64 = vector.multi_reduction <add>, %63, %cst_14 [2] : vector<4x8x8xf32> to vector<4x8xf32>
    %65 = vector.shape_cast %64 : vector<4x8xf32> to vector<4x8x1xf32>
    %66 = tpu.reciprocal %65 {approx = true} : vector<4x8x1xf32> -> vector<4x8x1xf32>
    %67 = vector.broadcast %66 : vector<4x8x1xf32> to vector<4x8x8xf32>
    %68 = arith.mulf %63, %67 : vector<4x8x8xf32>
    %69 = arith.truncf %68 : vector<4x8x8xf32> to vector<4x8x8xbf16>
    "tpu.trace_start"() <{level = 10 : i32, message = "gqk,gkd->gqd"}> : () -> ()
    %cst_15 = arith.constant dense<0.000000e+00> : vector<4x8x128xf32>
    %70 = tpu.matmul %69, %54, %cst_15 {dimension_numbers = #tpu.dot_dimension_numbers<[2], [1], [1], [2], [0, 0, 0, 1, 1, 2], [0], [0]>} : vector<4x8x8xbf16>, vector<4x8x128xbf16>, vector<4x8x128xf32> -> vector<4x8x128xf32>
    "tpu.trace_stop"() : () -> ()
    %71 = vector.extract_strided_slice %70 {offsets = [0, 0, 0], sizes = [2, 8, 128], strides = [1, 1, 1]} : vector<4x8x128xf32> to vector<2x8x128xf32>
    %72 = vector.extract_strided_slice %70 {offsets = [2, 0, 0], sizes = [2, 8, 128], strides = [1, 1, 1]} : vector<4x8x128xf32> to vector<2x8x128xf32>
    %73 = arith.addf %71, %72 : vector<2x8x128xf32>
    %74 = vector.shape_cast %73 : vector<2x8x128xf32> to vector<16x128xf32>
    %75 = arith.truncf %74 : vector<16x128xf32> to vector<16x128xbf16>
    %c512 = arith.constant 512 : index
    %c0_16 = arith.constant 0 : index
    %76 = vector.load %arg1[%c512, %c0_16] : memref<896x128xbf16, #tpu.memory_space<vmem>>, vector<128x128xbf16>
    %cst_17 = arith.constant dense<0.000000e+00> : vector<16x128xf32>
    %77 = tpu.matmul %75, %76, %cst_17 {dimension_numbers = #tpu.dot_dimension_numbers<[1], [0], [0], [1], [0, 0, 1, 1], [], []>} : vector<16x128xbf16>, vector<128x128xbf16>, vector<16x128xf32> -> vector<16x128xf32>
    %78 = vector.extract_strided_slice %0 {offsets = [0, 0], sizes = [1, 128], strides = [1, 1]} : vector<48x128xf32> to vector<1x128xf32>
    %79 = vector.broadcast %78 : vector<1x128xf32> to vector<16x128xf32>
    %80 = arith.addf %77, %79 : vector<16x128xf32>
    %81 = tpu.iota {dimensions = array<i32: 1>} : vector<1x128xi32>
    %c32_i32_18 = arith.constant 32 : i32
    %82 = vector.broadcast %c32_i32_18 : i32 to vector<1x128xi32>
    %83 = arith.cmpi slt, %81, %82 : vector<1x128xi32>
    %84 = arith.extui %83 : vector<1x128xi1> to vector<1x128xi32>
    %85 = arith.sitofp %84 : vector<1x128xi32> to vector<1x128xf32>
    %86 = arith.addf %9, %80 : vector<16x128xf32>
    %87 = vector.extract_strided_slice %0 {offsets = [1, 0], sizes = [1, 128], strides = [1, 1]} : vector<48x128xf32> to vector<1x128xf32>
    %88 = vector.extract_strided_slice %0 {offsets = [2, 0], sizes = [1, 128], strides = [1, 1]} : vector<48x128xf32> to vector<1x128xf32>
    %cst_19 = arith.constant dense<0.000000e+00> : vector<16xf32>
    %89 = vector.multi_reduction <add>, %86, %cst_19 [1] : vector<16x128xf32> to vector<16xf32>
    %90 = vector.shape_cast %89 : vector<16xf32> to vector<16x1xf32>
    %cst_20 = arith.constant 3.125000e-02 : f32
    %91 = vector.broadcast %cst_20 : f32 to vector<16x1xf32>
    %92 = arith.mulf %90, %91 : vector<16x1xf32>
    %93 = vector.broadcast %92 : vector<16x1xf32> to vector<16x128xf32>
    %94 = arith.subf %86, %93 : vector<16x128xf32>
    %95 = arith.mulf %94, %94 : vector<16x128xf32>
    %96 = vector.broadcast %85 : vector<1x128xf32> to vector<16x128xf32>
    %97 = arith.mulf %95, %96 : vector<16x128xf32>
    %cst_21 = arith.constant dense<0.000000e+00> : vector<16xf32>
    %98 = vector.multi_reduction <add>, %97, %cst_21 [1] : vector<16x128xf32> to vector<16xf32>
    %99 = vector.shape_cast %98 : vector<16xf32> to vector<16x1xf32>
    %cst_22 = arith.constant 3.125000e-02 : f32
    %100 = vector.broadcast %cst_22 : f32 to vector<16x1xf32>
    %101 = arith.mulf %99, %100 : vector<16x1xf32>
    %cst_23 = arith.constant 9.99999974E-6 : f32
    %102 = vector.broadcast %cst_23 : f32 to vector<16x1xf32>
    %103 = arith.addf %101, %102 : vector<16x1xf32>
    %104 = math.rsqrt %103 : vector<16x1xf32>
    %105 = vector.broadcast %104 : vector<16x1xf32> to vector<16x128xf32>
    %106 = arith.mulf %94, %105 : vector<16x128xf32>
    %107 = vector.broadcast %87 : vector<1x128xf32> to vector<16x128xf32>
    %108 = arith.mulf %106, %107 : vector<16x128xf32>
    %109 = vector.broadcast %88 : vector<1x128xf32> to vector<16x128xf32>
    %110 = arith.addf %108, %109 : vector<16x128xf32>
    %111 = arith.truncf %110 : vector<16x128xf32> to vector<16x128xbf16>
    %c640 = arith.constant 640 : index
    %c0_24 = arith.constant 0 : index
    %112 = vector.load %arg1[%c640, %c0_24] : memref<896x128xbf16, #tpu.memory_space<vmem>>, vector<128x128xbf16>
    %cst_25 = arith.constant dense<0.000000e+00> : vector<16x128xf32>
    %113 = tpu.matmul %111, %112, %cst_25 {dimension_numbers = #tpu.dot_dimension_numbers<[1], [0], [0], [1], [0, 0, 1, 1], [], []>} : vector<16x128xbf16>, vector<128x128xbf16>, vector<16x128xf32> -> vector<16x128xf32>
    %114 = vector.extract_strided_slice %0 {offsets = [6, 0], sizes = [1, 128], strides = [1, 1]} : vector<48x128xf32> to vector<1x128xf32>
    %115 = vector.broadcast %114 : vector<1x128xf32> to vector<16x128xf32>
    %116 = arith.addf %113, %115 : vector<16x128xf32>
    %cst_26 = arith.constant 5.000000e-01 : f32
    %117 = vector.broadcast %cst_26 : f32 to vector<16x128xf32>
    %118 = arith.mulf %117, %116 : vector<16x128xf32>
    %cst_27 = arith.constant 4.471500e-02 : f32
    %119 = vector.broadcast %cst_27 : f32 to vector<16x128xf32>
    %120 = arith.mulf %119, %116 : vector<16x128xf32>
    %121 = arith.mulf %120, %116 : vector<16x128xf32>
    %122 = arith.mulf %121, %116 : vector<16x128xf32>
    %123 = arith.addf %116, %122 : vector<16x128xf32>
    %cst_28 = arith.constant 0.797884583 : f32
    %124 = vector.broadcast %cst_28 : f32 to vector<16x128xf32>
    %125 = arith.mulf %124, %123 : vector<16x128xf32>
    %126 = math.tanh %125 : vector<16x128xf32>
    %cst_29 = arith.constant 1.000000e+00 : f32
    %127 = vector.broadcast %cst_29 : f32 to vector<16x128xf32>
    %128 = arith.addf %127, %126 : vector<16x128xf32>
    %129 = arith.mulf %118, %128 : vector<16x128xf32>
    %130 = arith.truncf %129 : vector<16x128xf32> to vector<16x128xbf16>
    %c768 = arith.constant 768 : index
    %c0_30 = arith.constant 0 : index
    %131 = vector.load %arg1[%c768, %c0_30] : memref<896x128xbf16, #tpu.memory_space<vmem>>, vector<128x128xbf16>
    %cst_31 = arith.constant dense<0.000000e+00> : vector<16x128xf32>
    %132 = tpu.matmul %130, %131, %cst_31 {dimension_numbers = #tpu.dot_dimension_numbers<[1], [0], [0], [1], [0, 0, 1, 1], [], []>} : vector<16x128xbf16>, vector<128x128xbf16>, vector<16x128xf32> -> vector<16x128xf32>
    %133 = vector.extract_strided_slice %0 {offsets = [3, 0], sizes = [1, 128], strides = [1, 1]} : vector<48x128xf32> to vector<1x128xf32>
    %134 = vector.broadcast %133 : vector<1x128xf32> to vector<16x128xf32>
    %135 = arith.addf %132, %134 : vector<16x128xf32>
    %136 = arith.addf %110, %135 : vector<16x128xf32>
    %137 = vector.extract_strided_slice %0 {offsets = [4, 0], sizes = [1, 128], strides = [1, 1]} : vector<48x128xf32> to vector<1x128xf32>
    %138 = vector.extract_strided_slice %0 {offsets = [5, 0], sizes = [1, 128], strides = [1, 1]} : vector<48x128xf32> to vector<1x128xf32>
    %cst_32 = arith.constant dense<0.000000e+00> : vector<16xf32>
    %139 = vector.multi_reduction <add>, %136, %cst_32 [1] : vector<16x128xf32> to vector<16xf32>
    %140 = vector.shape_cast %139 : vector<16xf32> to vector<16x1xf32>
    %cst_33 = arith.constant 3.125000e-02 : f32
    %141 = vector.broadcast %cst_33 : f32 to vector<16x1xf32>
    %142 = arith.mulf %140, %141 : vector<16x1xf32>
    %143 = vector.broadcast %142 : vector<16x1xf32> to vector<16x128xf32>
    %144 = arith.subf %136, %143 : vector<16x128xf32>
    %145 = arith.mulf %144, %144 : vector<16x128xf32>
    %146 = vector.broadcast %85 : vector<1x128xf32> to vector<16x128xf32>
    %147 = arith.mulf %145, %146 : vector<16x128xf32>
    %cst_34 = arith.constant dense<0.000000e+00> : vector<16xf32>
    %148 = vector.multi_reduction <add>, %147, %cst_34 [1] : vector<16x128xf32> to vector<16xf32>
    %149 = vector.shape_cast %148 : vector<16xf32> to vector<16x1xf32>
    %cst_35 = arith.constant 3.125000e-02 : f32
    %150 = vector.broadcast %cst_35 : f32 to vector<16x1xf32>
    %151 = arith.mulf %149, %150 : vector<16x1xf32>
    %cst_36 = arith.constant 9.99999974E-6 : f32
    %152 = vector.broadcast %cst_36 : f32 to vector<16x1xf32>
    %153 = arith.addf %151, %152 : vector<16x1xf32>
    %154 = math.rsqrt %153 : vector<16x1xf32>
    %155 = vector.broadcast %154 : vector<16x1xf32> to vector<16x128xf32>
    %156 = arith.mulf %144, %155 : vector<16x128xf32>
    %157 = vector.broadcast %137 : vector<1x128xf32> to vector<16x128xf32>
    %158 = arith.mulf %156, %157 : vector<16x128xf32>
    %159 = vector.broadcast %138 : vector<1x128xf32> to vector<16x128xf32>
    %160 = arith.addf %158, %159 : vector<16x128xf32>
    %c0_37 = arith.constant 0 : index
    %c0_38 = arith.constant 0 : index
    %161 = vector.load %arg3[%c0_37, %c0_38] : memref<16x128xf32, #tpu.memory_space<vmem>>, vector<16x128xf32>
    tpu.vector_store %arg3[%c0_37, %c0_38], %160 {strides = array<i32>} : memref<16x128xf32, #tpu.memory_space<vmem>>, vector<16x128xf32>,
    return
  }
}

</mosaic_0001>

<bundles_post_ra>
// kernel: combine_embedding_forward.1
= control target key start
LH: loop header
LB: loop body
LE: loop exit
PB: predicated region body
PF: predicated region fallthrough
CT: control target
= control target key end

     0   :  { %8 = vsyncpa [#allocation3], 0  ;;  %s1798_s12 = smov [#allocation2]   ;;  %s2045_s0 = inlined_call_operand.vmem [shape: s32[16,1], index: 0, kind: input, shape index: {}]   ;;  %s2046_s1 = inlined_call_operand.hbm [shape: bf16[896,128], index: 1, kind: input, shape index: {}]   ;;  %s2047_s2 = inlined_call_operand.vmem [shape: f32[48,128], index: 2, kind: input, shape index: {}]   ;;  %s2048_s3 = inlined_call_operand.vmem [shape: f32[16,128], index: 3, kind: output, shape index: {}]  }
   0x1   :  { %s16_s13 = sshll.u32 %s1798_s12, 4  ;;  %s1774_s16 = scalar_lea.hbm %s2046_s1, 7168  ;;  %s17_s13 = int_to_ptr.vmem [resolvable:$true] %s16_s13 }
   0x2   :  { %p1775_p0 = scmp.ne.s32.totalorder %s2046_s1, %s1774_s16  ;;  %p1778_p1 = scmp.lt.u32.totalorder %s1774_s16, %s2046_s1 }
   0x4   :  { %p1780_p2 = pnand %p1778_p1, %p1775_p0 }
   0x6   :  { %1783 = shalt.err (!%p1780_p2)
}
   0x7   :  { %s1784_s21 = scalar_lea.vmem %s17_s13, 7168  ;;  %p1789_p4 = scmp.lt.s32.totalorder %s17_s13, %s17_s13 }
   0x8   :  { %p1785_p3 = scmp.ne.s32.totalorder %s17_s13, %s1784_s21  ;;  %p1790_p5 = scmp.lt.s32.totalorder %s1784_s21, %s1784_s21 }
   0xa   :  { %p1791_p6 = por %p1790_p5, %p1789_p4 }
   0xc   :  { %p1792_p7 = pnand %p1791_p6, %p1785_p3 }
   0xe   :  { %1795 = shalt.err (!%p1792_p7)
}
   0xf   :  { %s1799_s22 = smov 64   ;;  %s1800_s23 = smov 4  }
  0x10   :  { %22 = dma.hbm_to_vmem [thread:$0]  %s2046_s1, 7168, %s17_s13, [#allocation3], %s1799_s22, %s1799_s22, %s1800_s23  }
  0x11   :  { %1796 = dma.done.wait [#allocation3], 7168  }
  0x12   :  { %1797 = vsyncadd [#allocation3], 4294960128  ;;  %v1801_v0 = vmov 0   ;;  %v1802_v1 = vmov 0.0   ;;  %v35_v2 = vld [vmem:[%s2045_s0] sm:$0xff]  ;;  %v36_v4 = vld [vmem:[%s2045_s0 + $0x8] sm:$0xff]  ;;  %v37_v19 = vlaneseq }
  0x13   :  { %1689 = vset.pattern.permute.xlu0 %v1801_v0  ;;  %1486 = vmatprep.subr.bf16.mxu0 %v1802_v1  ;;  %v1690_v3 = vld [vmem:[#allocation2] sm:$0xff]   ;;  %v1691_v5 = vld [vmem:[#allocation2 + $0x8] sm:$0xff]   ;;  %vm1803_vm0 = vmmov 0   ;;  %v1692_v6 = vld [vmem:[#allocation2 + $0x10] sm:$0xff]   ;;  %v1804_v24 = vmov 1.0|1.0  }
  0x14   :  { %1506 = vmatprep.subr.bf16.mxu1 %v1802_v1  ;;  %40 = vperm.xlu0 %1689, %v35_v2   ;;  %v1698_v7 = vld [vmem:[#allocation2 + $0x40] sm:$0xff]   ;;  %v1693_v8 = vld [vmem:[#allocation2 + $0x18] sm:$0xff]   ;;  %v1700_v9 = vld [vmem:[#allocation2 + $0x48] sm:$0xff]   ;;  %v1865_v21 = vand.u32 127, %v37_v19  ;;  %v1901_v46 = vshrl.u32 %v37_v19, 7  ;;  %vm723_vm8 = vcmask 1043456  }
  0x15   :  { %1487 = vmatpush3.bf16.msra.mxu0 %v1690_v3  ;;  %1502 = vmatprep.mubr.msk.bf16.mxu0 %vm1803_vm0, %v1802_v1  ;;  %v1694_v10 = vld [vmem:[#allocation2 + $0x20] sm:$0xff]   ;;  %v1702_v11 = vld [vmem:[#allocation2 + $0x50] sm:$0xff]   ;;  %v1695_v12 = vld [vmem:[#allocation2 + $0x28] sm:$0xff]   ;;  %vm671_vm9 = vcmask 64512  }
  0x16   :  { %1488 = vmatprep.subr.bf16.mxu0 %v1802_v1  ;;  %1522 = vmatprep.mubr.msk.bf16.mxu1 %vm1803_vm0, %v1802_v1  ;;  %v1704_v13 = vld [vmem:[#allocation2 + $0x58] sm:$0xff]   ;;  %v1696_v14 = vld [vmem:[#allocation2 + $0x30] sm:$0xff]   ;;  %v1706_v15 = vld [vmem:[#allocation2 + $0x60] sm:$0xff]   ;;  %v285_v47 = vsub.s32 0, %v1901_v46  ;;  %vm485_vm4 = vcmp.lt.s32.totalorder %v1865_v21, 16  ;;  %v176_v50 = vsub.s32 7, %v1901_v46 }
  0x17   :  { %1507 = vmatpush3.bf16.msra.mxu1 %v1698_v7  ;;  %v1697_v16 = vld [vmem:[#allocation2 + $0x38] sm:$0xff]   ;;  %v1708_v17 = vld [vmem:[#allocation2 + $0x68] sm:$0xff]   ;;  %v1710_v18 = vld [vmem:[#allocation2 + $0x70] sm:$0xff]   ;;  %v1376_v53 = vsel %vm485_vm4, 1.0, %v1802_v1  ;;  %vm488_vm5 = vcmp.ge.s32.totalorder %v1865_v21, 16  ;;  %vm489_vm6 = vcmp.lt.s32.totalorder %v1865_v21, 32 }
  0x18   :  { %43 = vperm.xlu0 %1689, %v36_v4   ;;  %1508 = vmatprep.subr.bf16.mxu1 %v1802_v1  ;;  %v1699_v23 = vld [vmem:[#allocation2 + $0x80] sm:$0xff]   ;;  %v1701_v25 = vld [vmem:[#allocation2 + $0x88] sm:$0xff]   ;;  %v1703_v26 = vld [vmem:[#allocation2 + $0x90] sm:$0xff]  }
  0x19   :  { %1489 = vmatpush3.bf16.msra.mxu0 %v1691_v5  ;;  %v1705_v27 = vld [vmem:[#allocation2 + $0x98] sm:$0xff]   ;;  %v1707_v28 = vld [vmem:[#allocation2 + $0xa0] sm:$0xff]   ;;  %v1709_v29 = vld [vmem:[#allocation2 + $0xa8] sm:$0xff]  }
  0x1a   :  { %1490 = vmatprep.subr.bf16.mxu0 %v1802_v1  ;;  %v1711_v30 = vld [vmem:[#allocation2 + $0xb0] sm:$0xff]   ;;  %v1712_v31 = vld [vmem:[#allocation2 + $0x78] sm:$0xff]   ;;  %v1714_v36 = vld [vmem:[#allocation2 + $0xc0] sm:$0xff]  }
  0x1b   :  { %1509 = vmatpush3.bf16.msra.mxu1 %v1700_v9  ;;  %v1713_v32 = vld [vmem:[#allocation2 + $0xb8] sm:$0xff]   ;;  %v1715_v39 = vld [vmem:[#allocation2 + $0xc8] sm:$0xff]   ;;  %v1716_v40 = vld [vmem:[#allocation2 + $0xd0] sm:$0xff]  }
  0x1c   :  { %1510 = vmatprep.subr.bf16.mxu1 %v1802_v1  ;;  %v1717_v41 = vld [vmem:[#allocation2 + $0xd8] sm:$0xff]   ;;  %v1718_v42 = vld [vmem:[#allocation2 + $0xe0] sm:$0xff]   ;;  %v1719_v43 = vld [vmem:[#allocation2 + $0xe8] sm:$0xff]  }
  0x1d   :  { %1491 = vmatpush3.bf16.msra.mxu0 %v1692_v6  ;;  %v1720_v44 = vld [vmem:[#allocation2 + $0xf0] sm:$0xff]   ;;  %v1721_v45 = vld [vmem:[#allocation2 + $0xf8] sm:$0xff]   ;;  %v30_v48 = vld [vmem:[%s2047_s2 + $0x8] sm:$0xff] }
  0x1e   :  { %1492 = vmatprep.subr.bf16.mxu0 %v1802_v1  ;;  %v286_v49 = vrot.slane %v30_v48, %v285_v47  ;;  %v1915_v54 = vld [vmem:[%s2047_s2] sm:$0xff]  ;;  %vm490_vm7 = vmand %vm488_vm5, %vm489_vm6 }
  0x1f   :  { %1511 = vmatpush3.bf16.msra.mxu1 %v1702_v11  ;;  %v177_v63 = vrot.slane %v1915_v54, %v176_v50  ;;  %v1377_v7 = vsel %vm490_vm7, 1.0, %v1802_v1 }
  0x20   :  { %1512 = vmatprep.subr.bf16.mxu1 %v1802_v1 }
  0x21   :  { %1493 = vmatpush3.bf16.msra.mxu0 %v1693_v8 }
  0x22   :  { %1494 = vmatprep.subr.bf16.mxu0 %v1802_v1 }
  0x23   :  { %1513 = vmatpush3.bf16.msra.mxu1 %v1704_v13  ;;  %v394_v13 = vsub.s32 1, %v1901_v46 }
  0x24   :  { %1514 = vmatprep.subr.bf16.mxu1 %v1802_v1 }
  0x25   :  { %1495 = vmatpush3.bf16.msra.mxu0 %v1694_v10 }
  0x26   :  { %1496 = vmatprep.subr.bf16.mxu0 %v1802_v1 }
  0x27   :  { %1515 = vmatpush3.bf16.msra.mxu1 %v1706_v15  ;;  %v395_v15 = vrot.slane %v30_v48, %v394_v13 }
  0x28   :  { %1516 = vmatprep.subr.bf16.mxu1 %v1802_v1 }
  0x29   :  { %1497 = vmatpush3.bf16.msra.mxu0 %v1695_v12 }
  0x2a   :  { %1498 = vmatprep.subr.bf16.mxu0 %v1802_v1 }
  0x2b   :  { %1517 = vmatpush3.bf16.msra.mxu1 %v1708_v17 }
  0x2c   :  { %1518 = vmatprep.subr.bf16.mxu1 %v1802_v1 }
  0x2d   :  { %1499 = vmatpush3.bf16.msra.mxu0 %v1696_v14 }
  0x2e   :  { %1500 = vmatprep.subr.bf16.mxu0 %v1802_v1 }
  0x2f   :  { %1519 = vmatpush3.bf16.msra.mxu1 %v1710_v18 }
  0x30   :  { %1520 = vmatprep.subr.bf16.mxu1 %v1802_v1 }
  0x31   :  { %1501 = vmatpush3.bf16.msra.mxu0 %v1697_v16 }
  0x32   :  { %1526 = vmatprep.subr.bf16.mxu0 %v1802_v1 }
  0x33   :  { %1521 = vmatpush3.bf16.msra.mxu1 %v1712_v31 }
  0x34   :  { %1546 = vmatprep.subr.bf16.mxu1 %v1802_v1 }
  0x93   :  { %v41_v20 = vpop.permute.xlu0 %40 }
  0x94   :  { %vm45_vm1 = vcmp.eq.s32.totalorder %v1865_v21, %v41_v20 }
  0x97   :  { %v44_v22 = vpop.permute.xlu0 %43 }
  0x98   :  { %vm46_vm2 = vcmp.eq.s32.totalorder %v1865_v21, %v44_v22  ;;  %v1733_v21 = vld [vmem:[#allocation2 + $0x158] sm:$0xff]  }
  0x99   :  { %vm1350_vm3 = vmpackc.low %vm46_vm2, %vm45_vm1 }
  0x9a   :  { %1503 = vmatmul.mubr.msk.bf16.vlgmr.msra.gmra.mrb[0].mxu0 %vm1350_vm3, %v1804_v24 }
  0x9b   :  { %1527 = vmatpush3.bf16.msra.mxu0 %v1699_v23  ;;  %1542 = vmatprep.mubr.msk.bf16.mxu0 %vm1803_vm0, %v1802_v1 }
  0x9c   :  { %1528 = vmatprep.subr.bf16.mxu0 %v1802_v1 }
  0x9f   :  { %1529 = vmatpush3.bf16.msra.mxu0 %v1701_v25 }
  0xa0   :  { %1530 = vmatprep.subr.bf16.mxu0 %v1802_v1 }
  0xa3   :  { %1531 = vmatpush3.bf16.msra.mxu0 %v1703_v26 }
  0xa4   :  { %1532 = vmatprep.subr.bf16.mxu0 %v1802_v1 }
  0xa7   :  { %1533 = vmatpush3.bf16.msra.mxu0 %v1705_v27 }
  0xa8   :  { %1534 = vmatprep.subr.bf16.mxu0 %v1802_v1 }
  0xab   :  { %1535 = vmatpush3.bf16.msra.mxu0 %v1707_v28 }
  0xac   :  { %1536 = vmatprep.subr.bf16.mxu0 %v1802_v1 }
  0xaf   :  { %1537 = vmatpush3.bf16.msra.mxu0 %v1709_v29 }
  0xb0   :  { %1538 = vmatprep.subr.bf16.mxu0 %v1802_v1 }
  0xb3   :  { %1539 = vmatpush3.bf16.msra.mxu0 %v1711_v30 }
  0xb4   :  { %1540 = vmatprep.subr.bf16.mxu0 %v1802_v1 }
  0xb7   :  { %1541 = vmatpush3.bf16.msra.mxu0 %v1713_v32 }
  0xb8   :  { %1590 = vmatprep.subr.bf16.mxu0 %v1802_v1 }
 0x16d   :  { %v1880_v33 = vpop.f32.mrb[0].mxu0 }
 0x16e   :  { %v1504_v34 = vpop.f32.mrb[1].mxu0 }
 0x16f   :  { %v1882_v35 = vpop.f32.mrb[2].mxu0 }
 0x170   :  { %v157_v37 = vpack.c.bf16 %v1882_v35, %v1880_v33  ;;  %v1505_v38 = vpop.f32.mrb[3].mxu0 }
 0x172   :  { %1523 = vmatmul.mubr.bf16.vlgmr.msra.gmra.mrb[0].mxu1 %v157_v37  ;;  %1543 = vmatmul.mubr.bf16.vlgmr.msra.gmra.mrb[4].mxu0 %v157_v37 }
 0x173   :  { %1547 = vmatpush3.bf16.msra.mxu1 %v1714_v36  ;;  %1562 = vmatprep.mubr.msk.bf16.mxu1 %vm1803_vm0, %v1802_v1 }
 0x174   :  { %1548 = vmatprep.subr.bf16.mxu1 %v1802_v1  ;;  %1592 = vmatprep.mubr.msk.bf16.mxu0 %vm1803_vm0, %v1802_v1 }
 0x177   :  { %1549 = vmatpush3.bf16.msra.mxu1 %v1715_v39 }
 0x178   :  { %1550 = vmatprep.subr.bf16.mxu1 %v1802_v1 }
 0x17b   :  { %1551 = vmatpush3.bf16.msra.mxu1 %v1716_v40 }
 0x17c   :  { %1552 = vmatprep.subr.bf16.mxu1 %v1802_v1 }
 0x17f   :  { %1553 = vmatpush3.bf16.msra.mxu1 %v1717_v41 }
 0x180   :  { %1554 = vmatprep.subr.bf16.mxu1 %v1802_v1 }
 0x183   :  { %1555 = vmatpush3.bf16.msra.mxu1 %v1718_v42 }
 0x184   :  { %1556 = vmatprep.subr.bf16.mxu1 %v1802_v1 }
 0x187   :  { %1557 = vmatpush3.bf16.msra.mxu1 %v1719_v43 }
 0x188   :  { %1558 = vmatprep.subr.bf16.mxu1 %v1802_v1 }
 0x18b   :  { %1559 = vmatpush3.bf16.msra.mxu1 %v1720_v44  ;;  %v32_v44 = vld [vmem:[%s2047_s2 + $0x18] sm:$0xff] }
 0x18c   :  { %1560 = vmatprep.subr.bf16.mxu1 %v1802_v1 }
 0x18f   :  { %1561 = vmatpush3.bf16.msra.mxu1 %v1721_v45 }
 0x190   :  { %1566 = vmatprep.subr.bf16.mxu1 %v1802_v1 }
 0x192   :  { %1563 = vmatmul.mubr.bf16.vlgmr.msra.gmra.mrb[4].mxu1 %v157_v37  ;;  %v31_v37 = vld [vmem:[%s2047_s2 + $0x10] sm:$0xff] }
 0x193   :  { %1568 = vmatprep.mubr.msk.bf16.mxu1 %vm1803_vm0, %v1802_v1 }
 0x245   :  { %v260_v51 = vpop.f32.mrb[0].mxu1  ;;  %v369_v52 = vpop.f32.mrb[4].mxu0 }
 0x246   :  { %v370_v55 = vadd.f32 %v369_v52, %v286_v49  ;;  %v1524_v56 = vpop.f32.mrb[1].mxu1  ;;  %v1544_v57 = vpop.f32.mrb[5].mxu0  ;;  %v261_v3 = vadd.f32 %v260_v51, %v177_v63 }
 0x247   :  { %v263_v58 = vpop.f32.mrb[2].mxu1  ;;  %v372_v59 = vpop.f32.mrb[6].mxu0 }
 0x248   :  { %v495_v60 = vmul.f32 %v1376_v53, %v370_v55  ;;  %v1525_v61 = vpop.f32.mrb[3].mxu1  ;;  %v1545_v62 = vpop.f32.mrb[7].mxu0  ;;  %v373_v2 = vadd.f32 %v372_v59, %v286_v49  ;;  %v493_v5 = vpack.c.bf16 %v261_v3, %v261_v3  ;;  %v264_v8 = vadd.f32 %v263_v58, %v177_v63 }
 0x249   :  { %v497_v9 = vmul.f32 %v1377_v7, %v370_v55  ;;  %v34_v61 = vld [vmem:[%s2047_s2 + $0x28] sm:$0xff] }
 0x24a   :  { %v499_v0 = vpack.c.bf16 %v495_v60, %v495_v60  ;;  %v496_v4 = vmul.f32 %v1376_v53, %v373_v2  ;;  %v494_v10 = vpack.c.bf16 %v264_v8, %v264_v8  ;;  %v498_v12 = vmul.f32 %v1377_v7, %v373_v2 }
 0x24b   :  { %v501_v11 = vpack.c.bf16 %v497_v9, %v497_v9 }
 0x24c   :  { %1567 = vmatpush3.bf16.xpose.msra.mxu1 %v499_v0  ;;  %v500_v6 = vpack.c.bf16 %v496_v4, %v496_v4  ;;  %v502_v14 = vpack.c.bf16 %v498_v12, %v498_v12 }
 0x24d   :  { %1572 = vmatprep.subr.bf16.mxu1 %v1802_v1 }
 0x253   :  { %1569 = vmatmul.mubr.bf16.vlgmr.msra.gmra.mrb[8].mxu1 %v493_v5 }
 0x254   :  { %1573 = vmatpush3.bf16.xpose.msra.mxu1 %v500_v6  ;;  %1574 = vmatprep.mubr.msk.bf16.mxu1 %vm1803_vm0, %v1802_v1 }
 0x255   :  { %1578 = vmatprep.subr.bf16.mxu1 %v1802_v1 }
 0x25b   :  { %1575 = vmatmul.mubr.bf16.vlgmr.msra.gmra.mrb[12].mxu1 %v494_v10 }
 0x25c   :  { %1579 = vmatpush3.bf16.xpose.msra.mxu1 %v501_v11  ;;  %1580 = vmatprep.mubr.msk.bf16.mxu1 %vm1803_vm0, %v1802_v1 }
 0x25d   :  { %1584 = vmatprep.subr.bf16.mxu1 %v1802_v1 }
 0x263   :  { %1581 = vmatmul.mubr.bf16.vlgmr.msra.gmra.mrb[16].mxu1 %v493_v5 }
 0x264   :  { %1585 = vmatpush3.bf16.xpose.msra.mxu1 %v502_v14  ;;  %1586 = vmatprep.mubr.msk.bf16.mxu1 %vm1803_vm0, %v1802_v1 }
 0x265   :  { %v478_v16 = vpop.f32.mrb[4].mxu1  ;;  %1596 = vmatprep.subr.bf16.mxu1 %v1802_v1 }
 0x266   :  { %v479_v17 = vadd.f32 %v478_v16, %v395_v15  ;;  %v1564_v18 = vpop.f32.mrb[5].mxu1 }
 0x267   :  { %v481_v19 = vpop.f32.mrb[6].mxu1 }
 0x268   :  { %v503_v20 = vmul.f32 %v1376_v53, %v479_v17  ;;  %v505_v22 = vmul.f32 %v1377_v7, %v479_v17  ;;  %v482_v23 = vadd.f32 %v481_v19, %v395_v15  ;;  %v1565_v24 = vpop.f32.mrb[7].mxu1 }
 0x26a   :  { %v507_v25 = vpack.c.bf16 %v503_v20, %v503_v20  ;;  %v509_v26 = vpack.c.bf16 %v505_v22, %v505_v22  ;;  %v504_v27 = vmul.f32 %v1376_v53, %v482_v23  ;;  %v506_v28 = vmul.f32 %v1377_v7, %v482_v23  ;;  %v33_v53 = vld [vmem:[%s2047_s2 + $0x20] sm:$0xff] }
 0x26b   :  { %1587 = vmatmul.mubr.bf16.vlgmr.msra.gmra.mrb[20].mxu1 %v494_v10 }
 0x26c   :  { %v508_v29 = vpack.c.bf16 %v504_v27, %v504_v27  ;;  %v510_v30 = vpack.c.bf16 %v506_v28, %v506_v28  ;;  %v725_v31 = vsel %vm723_vm8, %v507_v25, 0  ;;  %v1936_v32 = vsel %vm723_vm8, %v509_v26, 0  ;;  %1598 = vmatprep.mubr.msk.bf16.mxu1 %vm1803_vm0, %v1802_v1 }
 0x26d   :  { %1591 = vmatpush3.bf16.msra.mxu0 %v725_v31 }
 0x26e   :  { %v771_v34 = vsel %vm723_vm8, %v508_v29, 0  ;;  %1602 = vmatprep.subr.bf16.mxu0 %v1802_v1  ;;  %v1941_v36 = vsel %vm723_vm8, %v510_v30, 0 }
 0x26f   :  { %1597 = vmatpush3.bf16.msra.mxu1 %v771_v34 }
 0x270   :  { %1608 = vmatprep.subr.bf16.mxu1 %v1802_v1 }
 0x326   :  { %v545_v38 = vpop.f32.mrb[8].mxu1 }
 0x327   :  { %v546_v39 = vadd.f32 %v545_v38, %v31_v37  ;;  %v1570_v40 = vpop.f32.mrb[9].mxu1 }
 0x328   :  { %v548_v41 = vpop.f32.mrb[10].mxu1 }
 0x329   :  { %v1571_v42 = vpop.f32.mrb[11].mxu1  ;;  %v672_v43 = vsel %vm671_vm9, %v546_v39, -inf }
 0x32a   :  { %673 = vmax.xlane.f32.xlu1 %v672_v43  ;;  %v1722_v42 = vld [vmem:[#allocation2 + $0x100] sm:$0xff]  }
 0x32e   :  { %v585_v45 = vpop.f32.mrb[12].mxu1 }
 0x32f   :  { %v586_v48 = vadd.f32 %v585_v45, %v32_v44  ;;  %v1576_v49 = vpop.f32.mrb[13].mxu1  ;;  %v1723_v44 = vld [vmem:[#allocation2 + $0x108] sm:$0xff]  }
 0x330   :  { %v588_v50 = vpop.f32.mrb[14].mxu1 }
 0x331   :  { %v1577_v51 = vpop.f32.mrb[15].mxu1  ;;  %v675_v52 = vsel %vm671_vm9, %v586_v48, -inf  ;;  %v1725_v50 = vld [vmem:[#allocation2 + $0x118] sm:$0xff]  }
 0x332   :  { %676 = vmax.xlane.f32.xlu1 %v675_v52  ;;  %v1726_v51 = vld [vmem:[#allocation2 + $0x120] sm:$0xff]   ;;  %v1727_v52 = vld [vmem:[#allocation2 + $0x128] sm:$0xff]  }
 0x336   :  { %v625_v55 = vpop.f32.mrb[16].mxu1 }
 0x337   :  { %v626_v56 = vadd.f32 %v625_v55, %v33_v53  ;;  %v1582_v57 = vpop.f32.mrb[17].mxu1  ;;  %v1728_v53 = vld [vmem:[#allocation2 + $0x130] sm:$0xff]   ;;  %v1729_v55 = vld [vmem:[#allocation2 + $0x138] sm:$0xff]  }
 0x338   :  { %v628_v58 = vpop.f32.mrb[18].mxu1 }
 0x339   :  { %v1583_v59 = vpop.f32.mrb[19].mxu1  ;;  %v678_v60 = vsel %vm671_vm9, %v626_v56, -inf }
 0x33a   :  { %679 = vmax.xlane.f32.xlu0 %v678_v60 }
 0x33e   :  { %v665_v62 = vpop.f32.mrb[20].mxu1 }
 0x33f   :  { %v666_v63 = vadd.f32 %v665_v62, %v34_v61  ;;  %v1588_v0 = vpop.f32.mrb[21].mxu1 }
 0x340   :  { %v668_v2 = vpop.f32.mrb[22].mxu1 }
 0x341   :  { %v1589_v3 = vpop.f32.mrb[23].mxu1  ;;  %v681_v4 = vsel %vm671_vm9, %v666_v63, -inf  ;;  %v927_v2 = vrot.slane %v1915_v54, %v285_v47 }
 0x342   :  { %682 = vmax.xlane.f32.xlu1 %v681_v4 }
 0x3b7   :  { %v674_v5 = vpop.xlane.xlu1 %673 }
 0x3b8   :  { %v684_v6 = vsub.f32 %v546_v39, %v674_v5 }
 0x3ba   :  { %v688_v7 = vmul.f32 1.442695, %v684_v6 }
 0x3bc   :  { %1746 = vpow2.f32 %v688_v7 }
 0x3bf   :  { %v677_v8 = vpop.xlane.xlu1 %676 }
 0x3c0   :  { %v685_v9 = vsub.f32 %v586_v48, %v677_v8  ;;  %v1724_v48 = vld [vmem:[#allocation2 + $0x110] sm:$0xff]  }
 0x3c2   :  { %v690_v10 = vmul.f32 1.442695, %v685_v9 }
 0x3c4   :  { %1748 = vpow2.f32 %v690_v10 }
 0x3c6   :  { %v1747_v11 = vpop.eup %1746 }
 0x3c7   :  { %v680_v12 = vpop.xlane.xlu0 %679  ;;  %v696_v14 = vsel %vm671_vm9, %v1747_v11, 0.0 }
 0x3c8   :  { %v686_v15 = vsub.f32 %v626_v56, %v680_v12  ;;  %697 = vadd.xlane.f32.xlu1 %v696_v14 }
 0x3ca   :  { %v692_v16 = vmul.f32 1.442695, %v686_v15 }
 0x3cc   :  { %1750 = vpow2.f32 %v692_v16  ;;  %v1999_v16 = vsel %vm489_vm6, 1.0, %v1802_v1 }
 0x3ce   :  { %v1749_v17 = vpop.eup %1748 }
 0x3cf   :  { %v683_v18 = vpop.xlane.xlu1 %682  ;;  %v699_v19 = vsel %vm671_vm9, %v1749_v17, 0.0 }
 0x3d0   :  { %v687_v20 = vsub.f32 %v666_v63, %v683_v18  ;;  %700 = vadd.xlane.f32.xlu1 %v699_v19 }
 0x3d2   :  { %v694_v22 = vmul.f32 1.442695, %v687_v20 }
 0x3d4   :  { %1752 = vpow2.f32 %v694_v22  ;;  %v1731_v22 = vld [vmem:[#allocation2 + $0x148] sm:$0xff]  }
 0x3d6   :  { %v1751_v23 = vpop.eup %1750 }
 0x3d7   :  { %v702_v24 = vsel %vm671_vm9, %v1751_v23, 0.0 }
 0x3d8   :  { %703 = vadd.xlane.f32.xlu1 %v702_v24  ;;  %v1734_v24 = vld [vmem:[#allocation2 + $0x160] sm:$0xff]  }
 0x3de   :  { %v1753_v25 = vpop.eup %1752 }
 0x3df   :  { %v705_v26 = vsel %vm671_vm9, %v1753_v25, 0.0 }
 0x3e0   :  { %706 = vadd.xlane.f32.xlu1 %v705_v26  ;;  %v1736_v26 = vld [vmem:[#allocation2 + $0x170] sm:$0xff]  }
 0x455   :  { %v698_v27 = vpop.xlane.xlu1 %697 }
 0x456   :  { %1754 = vrcp.f32 %v698_v27  ;;  %v1737_v27 = vld [vmem:[#allocation2 + $0x178] sm:$0xff]  }
 0x45d   :  { %v701_v28 = vpop.xlane.xlu1 %700 }
 0x45e   :  { %1756 = vrcp.f32 %v701_v28 }
 0x460   :  { %v1755_v29 = vpop.eup %1754 }
 0x461   :  { %v712_v30 = vmul.f32 %v1755_v29, %v1747_v11  ;;  %v1730_v11 = vld [vmem:[#allocation2 + $0x140] sm:$0xff]  }
 0x463   :  { %v716_v31 = vpack.c.bf16 %v712_v30, %v712_v30 }
 0x465   :  { %1593 = vmatmul.mubr.msk.bf16.vlgmr.msra.gmra.mrb[8].mxu0 %vm671_vm9, %v716_v31  ;;  %v704_v34 = vpop.xlane.xlu1 %703 }
 0x466   :  { %1603 = vmatpush3.bf16.msra.mxu0 %v1936_v32  ;;  %1758 = vrcp.f32 %v704_v34  ;;  %1604 = vmatprep.mubr.msk.bf16.mxu0 %vm1803_vm0, %v1802_v1 }
 0x467   :  { %1614 = vmatprep.subr.bf16.mxu0 %v1802_v1 }
 0x468   :  { %v1757_v37 = vpop.eup %1756 }
 0x469   :  { %v713_v38 = vmul.f32 %v1757_v37, %v1749_v17 }
 0x46b   :  { %v717_v39 = vpack.c.bf16 %v713_v38, %v713_v38 }
 0x46d   :  { %1599 = vmatmul.mubr.msk.bf16.vlgmr.msra.gmra.mrb[24].mxu1 %vm671_vm9, %v717_v39  ;;  %v707_v40 = vpop.xlane.xlu1 %706  ;;  %v1048_v39 = vrot.slane %v1915_v54, %v394_v13  ;;  %v1739_v13 = vld [vmem:[#allocation2 + $0x188] sm:$0xff]  }
 0x46e   :  { %1609 = vmatpush3.bf16.msra.mxu1 %v1941_v36  ;;  %1760 = vrcp.f32 %v707_v40  ;;  %1610 = vmatprep.mubr.msk.bf16.mxu1 %vm1803_vm0, %v1802_v1 }
 0x46f   :  { %1634 = vmatprep.subr.bf16.mxu1 %v1802_v1 }
 0x470   :  { %v1759_v32 = vpop.eup %1758 }
 0x471   :  { %v714_v41 = vmul.f32 %v1759_v32, %v1751_v23  ;;  %v1732_v23 = vld [vmem:[#allocation2 + $0x150] sm:$0xff]   ;;  %v1053_v32 = vsub.s32 2, %v1901_v46 }
 0x473   :  { %v718_v43 = vpack.c.bf16 %v714_v41, %v714_v41 }
 0x475   :  { %1605 = vmatmul.mubr.msk.bf16.vlgmr.msra.gmra.mrb[8].mxu0 %vm671_vm9, %v718_v43 }
 0x476   :  { %1615 = vmatpush3.bf16.msra.mxu0 %v1722_v42  ;;  %1630 = vmatprep.mubr.msk.bf16.mxu0 %vm1803_vm0, %v1802_v1 }
 0x477   :  { %1616 = vmatprep.subr.bf16.mxu0 %v1802_v1 }
 0x478   :  { %v1761_v36 = vpop.eup %1760 }
 0x479   :  { %v715_v45 = vmul.f32 %v1761_v36, %v1753_v25  ;;  %v1735_v25 = vld [vmem:[#allocation2 + $0x168] sm:$0xff]  }
 0x47a   :  { %1617 = vmatpush3.bf16.msra.mxu0 %v1723_v44  ;;  %v1054_v44 = vrot.slane %v1915_v54, %v1053_v32 }
 0x47b   :  { %v719_v49 = vpack.c.bf16 %v715_v45, %v715_v45  ;;  %1618 = vmatprep.subr.bf16.mxu0 %v1802_v1 }
 0x47d   :  { %1611 = vmatmul.mubr.msk.bf16.vlgmr.msra.gmra.mrb[24].mxu1 %vm671_vm9, %v719_v49 }
 0x47e   :  { %1619 = vmatpush3.bf16.msra.mxu0 %v1724_v48  ;;  %1650 = vmatprep.mubr.msk.bf16.mxu1 %vm1803_vm0, %v1802_v1 }
 0x47f   :  { %1620 = vmatprep.subr.bf16.mxu0 %v1802_v1  ;;  %1635 = vmatpush3.bf16.msra.mxu1 %v1730_v11 }
 0x480   :  { %1636 = vmatprep.subr.bf16.mxu1 %v1802_v1 }
 0x482   :  { %1621 = vmatpush3.bf16.msra.mxu0 %v1725_v50  ;;  %v1738_v50 = vld [vmem:[#allocation2 + $0x180] sm:$0xff]  }
 0x483   :  { %1622 = vmatprep.subr.bf16.mxu0 %v1802_v1  ;;  %1637 = vmatpush3.bf16.msra.mxu1 %v1731_v22 }
 0x484   :  { %1638 = vmatprep.subr.bf16.mxu1 %v1802_v1 }
 0x486   :  { %1623 = vmatpush3.bf16.msra.mxu0 %v1726_v51  ;;  %v1740_v51 = vld [vmem:[#allocation2 + $0x190] sm:$0xff]  }
 0x487   :  { %1624 = vmatprep.subr.bf16.mxu0 %v1802_v1  ;;  %1639 = vmatpush3.bf16.msra.mxu1 %v1732_v23 }
 0x488   :  { %1640 = vmatprep.subr.bf16.mxu1 %v1802_v1 }
 0x48a   :  { %1625 = vmatpush3.bf16.msra.mxu0 %v1727_v52  ;;  %v1741_v52 = vld [vmem:[#allocation2 + $0x198] sm:$0xff]  }
 0x48b   :  { %1626 = vmatprep.subr.bf16.mxu0 %v1802_v1  ;;  %1641 = vmatpush3.bf16.msra.mxu1 %v1733_v21 }
 0x48c   :  { %1642 = vmatprep.subr.bf16.mxu1 %v1802_v1 }
 0x48e   :  { %1627 = vmatpush3.bf16.msra.mxu0 %v1728_v53  ;;  %v1742_v53 = vld [vmem:[#allocation2 + $0x1a0] sm:$0xff]  }
 0x48f   :  { %1628 = vmatprep.subr.bf16.mxu0 %v1802_v1  ;;  %1643 = vmatpush3.bf16.msra.mxu1 %v1734_v24 }
 0x490   :  { %1644 = vmatprep.subr.bf16.mxu1 %v1802_v1 }
 0x492   :  { %1629 = vmatpush3.bf16.msra.mxu0 %v1729_v55  ;;  %v1743_v55 = vld [vmem:[#allocation2 + $0x1a8] sm:$0xff]  }
 0x493   :  { %1654 = vmatprep.subr.bf16.mxu0 %v1802_v1  ;;  %1645 = vmatpush3.bf16.msra.mxu1 %v1735_v25 }
 0x494   :  { %1646 = vmatprep.subr.bf16.mxu1 %v1802_v1 }
 0x497   :  { %1647 = vmatpush3.bf16.msra.mxu1 %v1736_v26 }
 0x498   :  { %1648 = vmatprep.subr.bf16.mxu1 %v1802_v1 }
 0x49b   :  { %1649 = vmatpush3.bf16.msra.mxu1 %v1737_v27 }
 0x548   :  { %v853_v56 = vpop.f32.mrb[8].mxu0 }
 0x549   :  { %v1606_v57 = vpop.f32.mrb[9].mxu0 }
 0x54a   :  { %v856_v58 = vpop.f32.mrb[10].mxu0  ;;  %v1745_v57 = vld [vmem:[#allocation2 + $0x1b8] sm:$0xff]  }
 0x54b   :  { %v1607_v59 = vpop.f32.mrb[11].mxu0  ;;  %v1076_v58 = vsub.s32 6, %v1901_v46 }
 0x54d   :  { %v1077_v59 = vrot.slane %v1915_v54, %v1076_v58 }
 0x550   :  { %v899_v60 = vpop.f32.mrb[24].mxu1 }
 0x551   :  { %v907_v61 = vpack.c.bf16 %v899_v60, %v853_v56  ;;  %v1612_v62 = vpop.f32.mrb[25].mxu1  ;;  %v1744_v56 = vld [vmem:[#allocation2 + $0x1b0] sm:$0xff]  }
 0x552   :  { %v902_v63 = vpop.f32.mrb[26].mxu1 }
 0x553   :  { %v1613_v0 = vpop.f32.mrb[27].mxu1  ;;  %1631 = vmatmul.mubr.bf16.vlgmr.msra.gmra.mrb[12].mxu0 %v907_v61 }
 0x554   :  { %1670 = vmatprep.mubr.msk.bf16.mxu0 %vm1803_vm0, %v1802_v1  ;;  %1655 = vmatpush3.bf16.msra.mxu0 %v1738_v50  ;;  %v1323_v50 = vsub.s32 4, %v1901_v46 }
 0x555   :  { %1656 = vmatprep.subr.bf16.mxu0 %v1802_v1 }
 0x558   :  { %1657 = vmatpush3.bf16.msra.mxu0 %v1739_v13  ;;  %v1329_v13 = vsub.s32 5, %v1901_v46 }
 0x559   :  { %1658 = vmatprep.subr.bf16.mxu0 %v1802_v1 }
 0x55c   :  { %1659 = vmatpush3.bf16.msra.mxu0 %v1740_v51  ;;  %v1324_v51 = vrot.slane %v1915_v54, %v1323_v50 }
 0x55d   :  { %1660 = vmatprep.subr.bf16.mxu0 %v1802_v1 }
 0x560   :  { %1661 = vmatpush3.bf16.msra.mxu0 %v1741_v52 }
 0x561   :  { %1662 = vmatprep.subr.bf16.mxu0 %v1802_v1 }
 0x564   :  { %1663 = vmatpush3.bf16.msra.mxu0 %v1742_v53  ;;  %v1330_v53 = vrot.slane %v1915_v54, %v1329_v13 }
 0x565   :  { %1664 = vmatprep.subr.bf16.mxu0 %v1802_v1 }
 0x568   :  { %1665 = vmatpush3.bf16.msra.mxu0 %v1743_v55 }
 0x569   :  { %1666 = vmatprep.subr.bf16.mxu0 %v1802_v1 }
 0x56c   :  { %1667 = vmatpush3.bf16.msra.mxu0 %v1744_v56 }
 0x56d   :  { %1668 = vmatprep.subr.bf16.mxu0 %v1802_v1 }
 0x570   :  { %1669 = vmatpush3.bf16.msra.mxu0 %v1745_v57 }
 0x626   :  { %v1010_v3 = vpop.f32.mrb[12].mxu0 }
 0x627   :  { %v1011_v4 = vadd.f32 %v1010_v3, %v927_v2  ;;  %v1632_v5 = vpop.f32.mrb[13].mxu0 }
 0x628   :  { %v1013_v6 = vpop.f32.mrb[14].mxu0 }
 0x629   :  { %v1014_v7 = vadd.f32 %v1013_v6, %v927_v2  ;;  %v1633_v8 = vpop.f32.mrb[15].mxu0  ;;  %v1019_v9 = vadd.f32 %v1011_v4, %v1880_v33 }
 0x62b   :  { %1021 = vadd.xlane.f32.xlu1 %v1019_v9  ;;  %v1020_v10 = vadd.f32 %v1014_v7, %v1882_v35 }
 0x62f   :  { %1023 = vadd.xlane.f32.xlu1 %v1020_v10 }
 0x6b8   :  { %v1022_v12 = vpop.xlane.xlu1 %1021 }
 0x6b9   :  { %v1025_v14 = vmul.f32 0.03125, %v1022_v12 }
 0x6bb   :  { %v1027_v15 = vsub.f32 %v1019_v9, %v1025_v14 }
 0x6bc   :  { %v1024_v47 = vpop.xlane.xlu1 %1023 }
 0x6bd   :  { %v1026_v17 = vmul.f32 0.03125, %v1024_v47  ;;  %v1029_v18 = vmul.f32 %v1027_v15, %v1027_v15 }
 0x6bf   :  { %v1028_v33 = vsub.f32 %v1020_v10, %v1026_v17  ;;  %v1031_v19 = vmul.f32 %v1999_v16, %v1029_v18 }
 0x6c1   :  { %1033 = vadd.xlane.f32.xlu1 %v1031_v19  ;;  %v1030_v35 = vmul.f32 %v1028_v33, %v1028_v33 }
 0x6c3   :  { %v1032_v20 = vmul.f32 %v1999_v16, %v1030_v35 }
 0x6c5   :  { %1035 = vadd.xlane.f32.xlu0 %v1032_v20  ;;  %v1204_v20 = vsub.s32 3, %v1901_v46 }
 0x6c7   :  { %v1205_v22 = vrot.slane %v1915_v54, %v1204_v20 }
 0x74e   :  { %v1034_v28 = vpop.xlane.xlu1 %1033 }
 0x74f   :  { %v1037_v29 = vmul.f32 0.03125, %v1034_v28 }
 0x751   :  { %v1039_v30 = vadd.f32 1e-05, %v1037_v29 }
 0x752   :  { %v1036_v31 = vpop.xlane.xlu0 %1035 }
 0x753   :  { %1762 = vrsqrt.f32 %v1039_v30  ;;  %v1038_v34 = vmul.f32 0.03125, %v1036_v31 }
 0x755   :  { %v1040_v37 = vadd.f32 1e-05, %v1038_v34 }
 0x757   :  { %1764 = vrsqrt.f32 %v1040_v37 }
 0x75d   :  { %v1763_v38 = vpop.eup %1762 }
 0x75e   :  { %v1043_v40 = vmul.f32 %v1763_v38, %v1027_v15 }
 0x760   :  { %v1049_v43 = vmul.f32 %v1048_v39, %v1043_v40 }
 0x761   :  { %v1765_v41 = vpop.eup %1764 }
 0x762   :  { %v1044_v42 = vmul.f32 %v1765_v41, %v1028_v33  ;;  %v2014_v45 = vadd.f32 %v1054_v44, %v1049_v43 }
 0x764   :  { %v1050_v36 = vmul.f32 %v1048_v39, %v1044_v42 }
 0x766   :  { %v2016_v48 = vadd.f32 %v1054_v44, %v1050_v36 }
 0x768   :  { %v1057_v49 = vpack.c.bf16 %v2016_v48, %v2014_v45 }
 0x76a   :  { %1651 = vmatmul.mubr.bf16.vlgmr.msra.gmra.mrb[28].mxu1 %v1057_v49 }
 0x83d   :  { %v1160_v60 = vpop.f32.mrb[28].mxu1 }
 0x83e   :  { %v1161_v61 = vadd.f32 %v1160_v60, %v1077_v59  ;;  %v1652_v62 = vpop.f32.mrb[29].mxu1 }
 0x83f   :  { %v1163_v63 = vpop.f32.mrb[30].mxu1 }
 0x840   :  { %v1169_v0 = vmul.f32 0.044715, %v1161_v61  ;;  %v1164_v2 = vadd.f32 %v1163_v63, %v1077_v59  ;;  %v1653_v3 = vpop.f32.mrb[31].mxu1  ;;  %v1167_v47 = vmul.f32 0.5, %v1161_v61 }
 0x842   :  { %v1171_v4 = vmul.f32 %v1169_v0, %v1161_v61  ;;  %v1170_v5 = vmul.f32 0.044715, %v1164_v2  ;;  %v1168_v17 = vmul.f32 0.5, %v1164_v2 }
 0x844   :  { %v1173_v6 = vmul.f32 %v1171_v4, %v1161_v61  ;;  %v1172_v7 = vmul.f32 %v1170_v5, %v1164_v2 }
 0x846   :  { %v1175_v8 = vadd.f32 %v1173_v6, %v1161_v61  ;;  %v1174_v9 = vmul.f32 %v1172_v7, %v1164_v2 }
 0x848   :  { %v1177_v10 = vmul.f32 0.7978846, %v1175_v8  ;;  %v1176_v1 = vadd.f32 %v1174_v9, %v1164_v2 }
 0x84a   :  { %1766 = vtanh.f32 %v1177_v10  ;;  %v1178_v11 = vmul.f32 0.7978846, %v1176_v1 }
 0x84c   :  { %1768 = vtanh.f32 %v1178_v11 }
 0x854   :  { %v1767_v12 = vpop.eup %1766 }
 0x855   :  { %v1181_v14 = vadd.f32 1.0, %v1767_v12 }
 0x856   :  { %v1769_v15 = vpop.eup %1768 }
 0x857   :  { %v1182_v18 = vadd.f32 1.0, %v1769_v15  ;;  %v1183_v33 = vmul.f32 %v1181_v14, %v1167_v47 }
 0x859   :  { %v1184_v19 = vmul.f32 %v1182_v18, %v1168_v17 }
 0x85b   :  { %v1185_v35 = vpack.c.bf16 %v1184_v19, %v1183_v33 }
 0x85d   :  { %1671 = vmatmul.mubr.bf16.vlgmr.msra.gmra.mrb[16].mxu0 %v1185_v35 }
 0x930   :  { %v1288_v23 = vpop.f32.mrb[16].mxu0 }
 0x931   :  { %v1289_v21 = vadd.f32 %v1288_v23, %v1205_v22  ;;  %v1672_v24 = vpop.f32.mrb[17].mxu0 }
 0x932   :  { %v1291_v25 = vpop.f32.mrb[18].mxu0 }
 0x933   :  { %v1292_v26 = vadd.f32 %v1291_v25, %v1205_v22  ;;  %v1673_v27 = vpop.f32.mrb[19].mxu0  ;;  %v1295_v28 = vadd.f32 %v1289_v21, %v2014_v45 }
 0x935   :  { %1297 = vadd.xlane.f32.xlu1 %v1295_v28  ;;  %v1296_v29 = vadd.f32 %v1292_v26, %v2016_v48 }
 0x937   :  { %1299 = vadd.xlane.f32.xlu0 %v1296_v29 }
 0x9c2   :  { %v1298_v30 = vpop.xlane.xlu1 %1297 }
 0x9c3   :  { %v1301_v31 = vmul.f32 0.03125, %v1298_v30 }
 0x9c4   :  { %v1300_v34 = vpop.xlane.xlu0 %1299 }
 0x9c5   :  { %v1303_v37 = vsub.f32 %v1295_v28, %v1301_v31  ;;  %v1302_v38 = vmul.f32 0.03125, %v1300_v34 }
 0x9c7   :  { %v1304_v39 = vsub.f32 %v1296_v29, %v1302_v38  ;;  %v1305_v40 = vmul.f32 %v1303_v37, %v1303_v37 }
 0x9c9   :  { %v1307_v32 = vmul.f32 %v1999_v16, %v1305_v40  ;;  %v1306_v41 = vmul.f32 %v1304_v39, %v1304_v39 }
 0x9cb   :  { %1309 = vadd.xlane.f32.xlu1 %v1307_v32  ;;  %v1308_v42 = vmul.f32 %v1999_v16, %v1306_v41 }
 0x9cd   :  { %1311 = vadd.xlane.f32.xlu0 %v1308_v42 }
 0xa58   :  { %v1310_v43 = vpop.xlane.xlu1 %1309 }
 0xa59   :  { %v1313_v44 = vmul.f32 0.03125, %v1310_v43 }
 0xa5a   :  { %v1312_v36 = vpop.xlane.xlu0 %1311 }
 0xa5b   :  { %v1315_v45 = vadd.f32 1e-05, %v1313_v44  ;;  %v1314_v48 = vmul.f32 0.03125, %v1312_v36 }
 0xa5d   :  { %1770 = vrsqrt.f32 %v1315_v45  ;;  %v1316_v49 = vadd.f32 1e-05, %v1314_v48 }
 0xa5f   :  { %1772 = vrsqrt.f32 %v1316_v49 }
 0xa67   :  { %v1771_v52 = vpop.eup %1770 }
 0xa68   :  { %v1319_v55 = vmul.f32 %v1771_v52, %v1303_v37 }
 0xa69   :  { %v1773_v16 = vpop.eup %1772 }
 0xa6a   :  { %v1325_v56 = vmul.f32 %v1324_v51, %v1319_v55  ;;  %v1320_v57 = vmul.f32 %v1773_v16, %v1304_v39 }
 0xa6c   :  { %v1331_v58 = vadd.f32 %v1330_v53, %v1325_v56  ;;  %v1326_v59 = vmul.f32 %v1324_v51, %v1320_v57 }
 0xa6e   :  { %1333 = vst [vmem:[%s2048_s3] sm:$0xff] %v1331_v58  ;;  %v1332_v60 = vadd.f32 %v1330_v53, %v1326_v59 }
 0xa70   :  { %1334 = vst [vmem:[%s2048_s3 + $0x8] sm:$0xff] %v1332_v60 }
 0xa71   :  { %1339 = vsyncpa [#allocation3], 1 }

</bundles_post_ra>
